<compile_context>
chip_gen: v7x
topology: tpu7x:2x2x1
jax: 0.10.0
libtpu: 0.0.40
codegen_flags: <defaults>
</compile_context>

<pallas_src>
import functools
import math

import jax
import jax.numpy as jnp
from jax.experimental import pallas as pl
from jax.experimental.pallas import tpu as pltpu

_LN100 = math.log(100.0)
_LN50 = math.log(50.0)
_OFFSET = 3.1415 / 2.0          # faithful to the torch module (NOT math.pi / 2)

# Pipeline footprint ~= 2 (double buffer) * (in tile + out tile)
#                    =  4 * tile_rows * model_dim * itemsize  <= _TILE_BUDGET_BYTES.
_TILE_BUDGET_BYTES = 16 << 20   # ~4 MiB of input per grid step at f32
_VMEM_LIMIT_BYTES = 32 << 20    # explicit scoped-VMEM limit, valid on v5e/v6e/v7x


def _time_encodings_kernel(x_ref, o_ref, *, model_dim, time_dim):
    x = x_ref[...]                                        # (tile_rows, model_dim)
    xf = x if x.dtype == jnp.float32 else x.astype(jnp.float32)

    # times[:, :1] == X[:, model_dim - time_dim]  (static column)
    col = model_dim - time_dim
    t = xf[:, col:col + 1]                                # (tile_rows, 1)

    # Constants generated in-kernel: one iota + EUP exp per tile (otherwise-idle
    # slots), removing constant HBM input streams and their double-buffers.
    j_i = jax.lax.broadcasted_iota(jnp.int32, (1, model_dim), 1)
    j = j_i.astype(jnp.float32)
    scale = (2.0 / model_dim) * j                         # 2*j / model_dim
    off = jnp.where(j_i % 2 == 0,
                    jnp.float32(0.0),
                    jnp.float32(_OFFSET))                 # (1, model_dim)

    freq0 = jnp.exp(jnp.float32(-_LN100) * scale)         # 1 / 100 ** (2j/d)
    acc = xf + jnp.sin(freq0 * t + off)
    if time_dim == 2:
        freq1 = jnp.exp(jnp.float32(-_LN50) * scale)      # 1 / 50 ** (2j/d)
        acc = acc + jnp.sin(freq1 * t + off)
    # time_dim != 2: positional_1 == 0, nothing to add (single-sin path).

    o_ref[...] = acc.astype(o_ref.dtype)


def _pick_tiling(n, model_dim, itemsize):
    """Returns (tile_rows, grid, divides_exactly)."""
    cap = max(8, (_TILE_BUDGET_BYTES // (4 * model_dim * itemsize)) // 8 * 8)

    if n % 8 != 0:
        # Sublane constraint: a tile must be a multiple of 8 rows or the full array.
        if 4 * n * model_dim * itemsize <= _TILE_BUDGET_BYTES:
            return n, 1, True                      # single full block, no padding
        # Large ragged n: cdiv grid with an implicit partial last block (no alias).
        return cap, pl.cdiv(n, cap), False

    tile = min(cap, n)
    # For large inputs target >= 4 grid steps so v7x's two TensorCores each get
    # >= 2 pipelined steps; negligible cost on single-TC v5e/v6e at these tile sizes.
    if n >= 4096:
        tile = min(tile, max(8, ((n // 4) // 8) * 8))
    tile = max(8, (tile // 8) * 8)

    # Prefer an exactly-dividing tile (no wrapper pad, alias-safe).
    t = tile
    while n % t != 0:
        t -= 8
    if t * 4 >= tile or t >= cap // 4:
        return t, n // t, True
    # Dividing tile would be pathologically small -> cdiv grid, no alias.
    return tile, pl.cdiv(n, tile), False


def time_encodings(x, *, model_dim, time_dim, tile_rows=None, donate_input=False):
    """out = X + sin(freq0*t + off) [+ sin(freq1*t + off)].

    donate_input=True enables in-place aliasing (only when the grid divides the row
    count exactly); pair it with jax.jit(..., donate_argnums=0) so XLA does not
    insert a defensive copy of x.
    """
    n, d = x.shape
    assert d == model_dim
    itemsize = jnp.dtype(x.dtype).itemsize

    if tile_rows is None:
        tile_rows, grid, divides = _pick_tiling(n, model_dim, itemsize)
    else:
        tile_rows = int(tile_rows)
        if tile_rows >= n:
            tile_rows, grid, divides = n, 1, True
        else:
            tile_rows = max(8, (tile_rows // 8) * 8)
            divides = (n % tile_rows == 0)
            grid = n // tile_rows if divides else pl.cdiv(n, tile_rows)

    kernel = functools.partial(_time_encodings_kernel,
                               model_dim=model_dim, time_dim=time_dim)

    # Alias only when every block is full: with a partial/revisited last block an
    # aliased input could be re-read after being written (double-applied encoding).
    alias = {0: 0} if (donate_input and divides) else {}

    out = pl.pallas_call(
        kernel,
        out_shape=jax.ShapeDtypeStruct((n, model_dim), x.dtype),
        grid_spec=pltpu.PrefetchScalarGridSpec(
            num_scalar_prefetch=0,
            grid=(grid,),
            in_specs=[pl.BlockSpec((tile_rows, model_dim), lambda i: (i, 0))],
            out_specs=pl.BlockSpec((tile_rows, model_dim), lambda i: (i, 0)),
        ),
        input_output_aliases=alias,
        compiler_params=pltpu.CompilerParams(
            dimension_semantics=("parallel",),
            vmem_limit_bytes=_VMEM_LIMIT_BYTES),
    )(x)
    return out


def time_encodings_ref(x, *, model_dim, time_dim):
    # Pure-JAX reference mirroring the PyTorch forward.
    j = jnp.arange(model_dim, dtype=jnp.float32)
    freq0 = (1.0 / 100.0 ** (2.0 * j / model_dim)).reshape(1, model_dim)
    offsets = jnp.where(j.astype(jnp.int32) % 2 == 0, 0.0, _OFFSET)
    offsets = offsets.reshape(1, model_dim).astype(jnp.float32)
    t = x.astype(jnp.float32)[:, model_dim - time_dim:model_dim - time_dim + 1]
    p0 = jnp.sin(freq0 * t + offsets)
    if time_dim == 2:
        freq1 = (1.0 / 50.0 ** (2.0 * j / model_dim)).reshape(1, model_dim)
        p1 = jnp.sin(freq1 * t + offsets)
    else:
        p1 = jnp.zeros_like(p0)
    return (x.astype(jnp.float32) + p0 + p1).astype(x.dtype)


if __name__ == "__main__":
    key = jax.random.PRNGKey(0)
    k1, k2, k3, k4 = jax.random.split(key, 4)

    # Case 1: toy (8, 32), time_dim=2, single block.
    d1, t1, n1 = 32, 2, 8
    x1 = jax.random.normal(k1, (n1, d1), dtype=jnp.float32)
    ref1 = time_encodings_ref(x1, model_dim=d1, time_dim=t1)
    out1 = jax.block_until_ready(time_encodings(x1, model_dim=d1, time_dim=t1))
    assert out1.shape == (n1, d1)
    assert jnp.allclose(out1, ref1, atol=1e-4, rtol=1e-4)

    # Case 2: (200, 128), time_dim=1, exactly-dividing multi-step grid (tile 40,
    # grid 5), donated input under jit -> real in-place aliasing, no padding.
    d2, t2, n2 = 128, 1, 200
    x2 = jax.random.normal(k2, (n2, d2), dtype=jnp.float32)
    ref2 = time_encodings_ref(x2, model_dim=d2, time_dim=t2)
    f2 = jax.jit(functools.partial(time_encodings, model_dim=d2, time_dim=t2,
                                   tile_rows=40, donate_input=True),
                 donate_argnums=0)
    out2 = jax.block_until_ready(f2(x2))
    assert out2.shape == (n2, d2)
    assert jnp.allclose(out2, ref2, atol=1e-4, rtol=1e-4)

    # Case 3: (200, 128), time_dim=2, non-dividing tile (64) -> pl.cdiv grid with an
    # implicit partial last block, output NOT aliased, no wrapper pad.
    d3, t3, n3 = 128, 2, 200
    x3 = jax.random.normal(k3, (n3, d3), dtype=jnp.float32)
    ref3 = time_encodings_ref(x3, model_dim=d3, time_dim=t3)
    out3 = jax.block_until_ready(
        time_encodings(x3, model_dim=d3, time_dim=t3, tile_rows=64))
    assert out3.shape == (n3, d3)
    assert jnp.allclose(out3, ref3, atol=1e-4, rtol=1e-4)

    # Case 4: n not a multiple of 8 -> single full-array block (no pad, no partials).
    d4, t4, n4 = 32, 2, 13
    x4 = jax.random.normal(k4, (n4, d4), dtype=jnp.float32)
    ref4 = time_encodings_ref(x4, model_dim=d4, time_dim=t4)
    out4 = jax.block_until_ready(time_encodings(x4, model_dim=d4, time_dim=t4))
    assert out4.shape == (n4, d4)
    assert jnp.allclose(out4, ref4, atol=1e-4, rtol=1e-4)

    print("KERNEL_OK")
</pallas_src>

<mosaic_0001>
module attributes {stable_mosaic.version = 11 : i64} {
  func.func @_time_encodings_kernel(%arg0: i32, %arg1: memref<8x32xf32, #tpu.memory_space<vmem>>, %arg2: memref<8x32xf32, #tpu.memory_space<vmem>>) attributes {dimension_semantics = [#tpu.dimension_semantics<parallel>], iteration_bounds = array<i64: 1>, scalar_prefetch = 0 : i64, scratch_operands = 0 : i64, tpu.core_type = #tpu.core_type<tc>, window_params = [{transform_indices = @transform_0, window_bounds = array<i64: 8, 32>}, {transform_indices = @transform_1, window_bounds = array<i64: 8, 32>}]} {
    %c0 = arith.constant 0 : index
    %c0_0 = arith.constant 0 : index
    %0 = vector.load %arg1[%c0, %c0_0] : memref<8x32xf32, #tpu.memory_space<vmem>>, vector<8x32xf32>
    %1 = vector.extract_strided_slice %0 {offsets = [0, 30], sizes = [8, 1], strides = [1, 1]} : vector<8x32xf32> to vector<8x1xf32>
    %2 = tpu.iota {dimensions = array<i32: 1>} : vector<1x32xi32>
    %3 = arith.sitofp %2 : vector<1x32xi32> to vector<1x32xf32>
    %cst = arith.constant 6.250000e-02 : f32
    %4 = vector.broadcast %cst : f32 to vector<1x32xf32>
    %5 = arith.mulf %4, %3 : vector<1x32xf32>
    %c2_i32 = arith.constant 2 : i32
    %c0_i32 = arith.constant 0 : i32
    %6 = arith.cmpi eq, %c2_i32, %c0_i32 : i32
    %c1_i32 = arith.constant 1 : i32
    %7 = arith.select %6, %c1_i32, %c2_i32 : i32
    %8 = vector.broadcast %7 : i32 to vector<1x32xi32>
    %9 = arith.remsi %2, %8 : vector<1x32xi32>
    %c0_i32_1 = arith.constant 0 : i32
    %10 = vector.broadcast %c0_i32_1 : i32 to vector<1x32xi32>
    %11 = arith.cmpi ne, %9, %10 : vector<1x32xi32>
    %c0_i32_2 = arith.constant 0 : i32
    %12 = vector.broadcast %c0_i32_2 : i32 to vector<1x32xi32>
    %13 = arith.cmpi slt, %9, %12 : vector<1x32xi32>
    %c0_i32_3 = arith.constant 0 : i32
    %14 = arith.cmpi slt, %7, %c0_i32_3 : i32
    %15 = vector.broadcast %14 : i1 to vector<1x32xi1>
    %16 = vector.broadcast %15 : vector<1x32xi1> to vector<1x32xi1>
    %17 = arith.xori %13, %16 : vector<1x32xi1>
    %18 = arith.andi %17, %11 : vector<1x32xi1>
    %19 = vector.broadcast %7 : i32 to vector<1x32xi32>
    %20 = arith.addi %9, %19 : vector<1x32xi32>
    %21 = arith.select %18, %20, %9 : vector<1x32xi1>, vector<1x32xi32>
    %c0_i32_4 = arith.constant 0 : i32
    %22 = vector.broadcast %c0_i32_4 : i32 to vector<1x32xi32>
    %23 = arith.cmpi eq, %21, %22 : vector<1x32xi32>
    %cst_5 = arith.constant 0.000000e+00 : f32
    %cst_6 = arith.constant 1.570750e+00 : f32
    %24 = vector.broadcast %cst_5 : f32 to vector<1x32xf32>
    %25 = vector.broadcast %cst_6 : f32 to vector<1x32xf32>
    %26 = arith.select %23, %24, %25 : vector<1x32xi1>, vector<1x32xf32>
    %cst_7 = arith.constant -4.60517025 : f32
    %27 = vector.broadcast %cst_7 : f32 to vector<1x32xf32>
    %28 = arith.mulf %27, %5 : vector<1x32xf32>
    %29 = math.exp %28 : vector<1x32xf32>
    %30 = vector.broadcast %29 : vector<1x32xf32> to vector<8x32xf32>
    %31 = vector.broadcast %1 : vector<8x1xf32> to vector<8x32xf32>
    %32 = arith.mulf %30, %31 : vector<8x32xf32>
    %33 = vector.broadcast %26 : vector<1x32xf32> to vector<8x32xf32>
    %34 = arith.addf %32, %33 : vector<8x32xf32>
    %35 = math.sin %34 : vector<8x32xf32>
    %36 = arith.addf %0, %35 : vector<8x32xf32>
    %cst_8 = arith.constant -3.91202307 : f32
    %37 = vector.broadcast %cst_8 : f32 to vector<1x32xf32>
    %38 = arith.mulf %37, %5 : vector<1x32xf32>
    %39 = math.exp %38 : vector<1x32xf32>
    %40 = vector.broadcast %39 : vector<1x32xf32> to vector<8x32xf32>
    %41 = vector.broadcast %1 : vector<8x1xf32> to vector<8x32xf32>
    %42 = arith.mulf %40, %41 : vector<8x32xf32>
    %43 = vector.broadcast %26 : vector<1x32xf32> to vector<8x32xf32>
    %44 = arith.addf %42, %43 : vector<8x32xf32>
    %45 = math.sin %44 : vector<8x32xf32>
    %46 = arith.addf %36, %45 : vector<8x32xf32>
    %c0_9 = arith.constant 0 : index
    %c0_10 = arith.constant 0 : index
    %47 = vector.load %arg2[%c0_9, %c0_10] : memref<8x32xf32, #tpu.memory_space<vmem>>, vector<8x32xf32>
    tpu.vector_store %arg2[%c0_9, %c0_10], %46 {strides = array<i32>} : memref<8x32xf32, #tpu.memory_space<vmem>>, vector<8x32xf32>,
    return
  }
  func.func @transform_0(%arg0: i32) -> (i32, i32) {
    %c0_i32 = arith.constant 0 : i32
    %c0_i32_0 = arith.constant 0 : i32
    return %arg0, %c0_i32 : i32, i32
  }
  func.func @transform_1(%arg0: i32) -> (i32, i32) {
    %c0_i32 = arith.constant 0 : i32
    %c0_i32_0 = arith.constant 0 : i32
    return %arg0, %c0_i32 : i32, i32
  }
}

</mosaic_0001>

<bundles_post_ra>
// kernel: tpu_custom_call.1
= control target key start
LH: loop header
LB: loop body
LE: loop exit
PB: predicated region body
PF: predicated region fallthrough
CT: control target
= control target key end

     0   :  { %6 = vsyncpa [#allocation3], 0  ;;  %s479_s0 = inlined_call_operand.hbm [shape: f32[8,32], index: 0, kind: input, shape index: {}]   ;;  %s480_s1 = inlined_call_operand.hbm [shape: f32[8,32], index: 1, kind: output, shape index: {}]  }
   0x1   :  { %7 = vsyncpa [#allocation4], 0  ;;  %s369_s6 = smov [#allocation2]   ;;  %s321_s10 = scalar_lea.hbm %s479_s0, 128 }
   0x2   :  { %s14_s7 = sshll.u32 %s369_s6, 4  ;;  %p322_p0 = scmp.ne.s32.totalorder %s479_s0, %s321_s10  ;;  %s15_s7 = int_to_ptr.vmem [resolvable:$true] %s14_s7 }
   0x3   :  { %p325_p1 = scmp.lt.u32.totalorder %s321_s10, %s479_s0 }
   0x5   :  { %p327_p2 = pnand %p325_p1, %p322_p0 }
   0x7   :  { %330 = shalt.err (!%p327_p2)
}
   0x8   :  { %s331_s15 = scalar_lea.vmem %s15_s7, 128  ;;  %p336_p4 = scmp.lt.s32.totalorder %s15_s7, %s15_s7 }
   0x9   :  { %p332_p3 = scmp.ne.s32.totalorder %s15_s7, %s331_s15  ;;  %p337_p5 = scmp.lt.s32.totalorder %s331_s15, %s331_s15 }
   0xb   :  { %p338_p6 = por %p337_p5, %p336_p4 }
   0xd   :  { %p339_p7 = pnand %p338_p6, %p332_p3 }
   0xf   :  { %342 = shalt.err (!%p339_p7)
}
  0x10   :  { %17 = dma.hbm_to_vmem [thread:$0]  %s479_s0, 128, %s15_s7, [#allocation3]  }
  0x11   :  { %365 = dma.done.wait [#allocation3], 128  }
  0x12   :  { %366 = vsyncadd [#allocation3], 4294967168  ;;  %v370_v0 = vmov 30   ;;  %v401_v1 = vld [vmem:[#allocation2] sm:$0xff]  ;;  %v22_v2 = vlaneseq  ;;  %v371_v13 = vmov 1.57075  }
  0x13   :  { %308 = vset.pattern.permute.xlu0 %v370_v0  ;;  %v372_v40 = vmov 683565275   ;;  %v373_v44 = vmov 2475754826   ;;  %v374_v46 = vmov 2131351028  }
  0x14   :  { %45 = vperm.xlu0 %308, %v401_v1   ;;  %v23_v3 = vand.u32 127, %v22_v2  ;;  %v375_v48 = vmov 2102212464   ;;  %v376_v50 = vmov 920167782   ;;  %s378_s0 = smov [#allocation5]  }
  0x15   :  { %v377_v57 = vmov 1326507024   ;;  %s273_s18 = sshll.u32 %s378_s0, 4  ;;  %s274_s18 = int_to_ptr.vmem [resolvable:$true] %s273_s18 }
  0x16   :  { %v24_v4 = vcvt.s32.f32 %v23_v3  ;;  %v30_v10 = vand.u32 1, %v23_v3  ;;  %s343_s19 = scalar_lea.vmem %s274_s18, 128  ;;  %p348_p9 = scmp.lt.s32.totalorder %s274_s18, %s274_s18 }
  0x17   :  { %p344_p8 = scmp.ne.s32.totalorder %s274_s18, %s343_s19  ;;  %p349_p10 = scmp.lt.s32.totalorder %s343_s19, %s343_s19 }
  0x18   :  { %v25_v5 = vmul.f32 0.0625, %v24_v4  ;;  %vm38_vm0 = vcmp.eq.s32.totalorder %v30_v10, 0 }
  0x19   :  { %v39_v14 = vsel %vm38_vm0, 0.0, %v371_v13  ;;  %p350_p11 = por %p349_p10, %p348_p9 }
  0x1a   :  { %v40_v6 = vmul.f32 -4.6051702, %v25_v5  ;;  %v155_v7 = vmul.f32 -3.912023, %v25_v5 }
  0x1b   :  { %p351_p12 = pnand %p350_p11, %p344_p8 }
  0x1c   :  { %v41_v8 = vmul.f32 1.442695, %v40_v6  ;;  %v156_v9 = vmul.f32 1.442695, %v155_v7 }
  0x1e   :  { %309 = vpow2.f32 %v41_v8 }
  0x1f   :  { %311 = vpow2.f32 %v156_v9 }
  0x28   :  { %v310_v11 = vpop.eup %309 }
  0x29   :  { %v312_v12 = vpop.eup %311 }
  0x93   :  { %v46_v15 = vpop.permute.xlu0 %45 }
  0x94   :  { %v48_v16 = vmul.f32 %v310_v11, %v46_v15  ;;  %v158_v17 = vmul.f32 %v312_v12, %v46_v15 }
  0x96   :  { %v404_v18 = vadd.f32 %v48_v16, %v39_v14  ;;  %v406_v19 = vadd.f32 %v158_v17, %v39_v14 }
  0x98   :  { %v50_v20 = vand.u32 2147483647, %v404_v18  ;;  %v53_v21 = vand.u32 2139095040, %v404_v18  ;;  %v163_v22 = vand.u32 2139095040, %v406_v19  ;;  %v160_v25 = vand.u32 2147483647, %v406_v19 }
  0x99   :  { %vm52_vm15 = vcmp.lt.s32.totalorder %v404_v18, 0 }
  0x9a   :  { %v54_v23 = vshrl.u32 %v53_v21, 23  ;;  %v57_v24 = vand.u32 8388607, %v50_v20  ;;  %v164_v26 = vshrl.u32 %v163_v22, 23  ;;  %v416_v31 = vand.u32 8388607, %v160_v25 }
  0x9b   :  { %vm51_vm0 = vcmp.le.f32.partialorder %v50_v20, 0.7853982 }
  0x9c   :  { %v282_v27 = vadd.s32 4294967169, %v54_v23  ;;  %v286_v28 = vadd.s32 4294967169, %v164_v26  ;;  %v58_v30 = vor.u32 8388608, %v57_v24  ;;  %v168_v38 = vor.u32 8388608, %v416_v31 }
  0x9e   :  { %v60_v29 = vadd.s32 1, %v282_v27  ;;  %v170_v32 = vadd.s32 1, %v286_v28  ;;  %v418_v37 = vshll.u32 %v58_v30, 8 }
  0xa0   :  { %vm61_vm1 = vcmp.gt.s32.totalorder %v60_v29, 0  ;;  %vm171_vm2 = vcmp.gt.s32.totalorder %v170_v32, 0 }
  0xa1   :  { %v62_v33 = vsel %vm61_vm1, %v60_v29, 0  ;;  %v172_v36 = vsel %vm171_vm2, %v170_v32, 0  ;;  %vm162_vm1 = vcmp.lt.s32.totalorder %v406_v19, 0  ;;  %vm161_vm2 = vcmp.le.f32.partialorder %v160_v25, 0.7853982 }
  0xa2   :  { %v63_v34 = vshrl.u32 %v62_v33, 5  ;;  %v64_v35 = vand.u32 31, %v62_v33  ;;  %v421_v42 = vshrl.u32 %v172_v36, 5  ;;  %v174_v43 = vand.u32 31, %v172_v36 }
  0xa3   :  { %v208_v33 = vshll.u32 %v168_v38, 8 }
  0xa4   :  { %v65_v39 = vsub.s32 32, %v64_v35  ;;  %v67_v41 = vshll.u32 %v372_v40, %v64_v35  ;;  %v70_v45 = vshll.u32 %v373_v44, %v64_v35  ;;  %v73_v47 = vshll.u32 %v374_v46, %v64_v35 }
  0xa5   :  { %v76_v49 = vshll.u32 %v375_v48, %v64_v35  ;;  %v79_v51 = vshll.u32 %v376_v50, %v64_v35  ;;  %vm82_vm3 = vcmp.lt.s32.totalorder %v63_v34, 1  ;;  %vm83_vm4 = vcmp.lt.s32.totalorder %v63_v34, 2 }
  0xa6   :  { %v68_v52 = vshrl.u32 %v373_v44, %v65_v39  ;;  %v71_v53 = vshrl.u32 %v374_v46, %v65_v39  ;;  %v74_v54 = vshrl.u32 %v375_v48, %v65_v39  ;;  %v66_v55 = vshrl.u32 %v372_v40, %v65_v39 }
  0xa7   :  { %v77_v56 = vshrl.u32 %v376_v50, %v65_v39  ;;  %v80_v58 = vshrl.u32 %v377_v57, %v65_v39  ;;  %v175_v62 = vsub.s32 32, %v174_v43  ;;  %vm84_vm5 = vcmp.lt.s32.totalorder %v63_v34, 3 }
  0xa8   :  { %v69_v59 = vor.u32 %v68_v52, %v67_v41  ;;  %v72_v60 = vor.u32 %v71_v53, %v70_v45  ;;  %v75_v61 = vor.u32 %v74_v54, %v73_v47  ;;  %vm85_vm6 = vcmp.lt.s32.totalorder %v63_v34, 4 }
  0xa9   :  { %v78_v63 = vor.u32 %v77_v56, %v76_v49  ;;  %v81_v0 = vor.u32 %v80_v58, %v79_v51  ;;  %v177_v9 = vshll.u32 %v372_v40, %v174_v43  ;;  %v178_v12 = vshrl.u32 %v373_v44, %v175_v62 }
  0xaa   :  { %v86_v2 = vsel %vm82_vm3, %v66_v55, %v69_v59  ;;  %v87_v3 = vsel %vm85_vm6, %v75_v61, 2102212464  ;;  %v90_v4 = vsel %vm82_vm3, %v69_v59, %v72_v60  ;;  %v94_v5 = vsel %vm82_vm3, %v72_v60, %v75_v61 }
  0xab   :  { %v88_v6 = vsel %vm84_vm5, %v72_v60, %v87_v3  ;;  %v91_v7 = vsel %vm85_vm6, %v78_v63, 920167782  ;;  %v95_v8 = vsel %vm85_vm6, %v81_v0, 1326507024  ;;  %v180_v13 = vshll.u32 %v373_v44, %v174_v43 }
  0xac   :  { %v92_v10 = vsel %vm84_vm5, %v75_v61, %v91_v7  ;;  %v96_v11 = vsel %vm84_vm5, %v78_v63, %v95_v8  ;;  %v89_v14 = vsel %vm83_vm4, %v86_v2, %v88_v6  ;;  %v181_v17 = vshrl.u32 %v374_v46, %v175_v62 }
  0xad   :  { %v93_v15 = vsel %vm83_vm4, %v90_v4, %v92_v10  ;;  %v97_v16 = vsel %vm83_vm4, %v94_v5, %v96_v11  ;;  %v179_v26 = vor.u32 %v178_v12, %v177_v9  ;;  %v183_v28 = vshll.u32 %v374_v46, %v174_v43 }
  0xae   :  { %v430_v21 = vmul.u32.u64.low %v418_v37, %v97_v16  ;;  %v431_v22 = vmul.u32.u64.high %v418_v37, %v97_v16, %v430_v21  ;;  %v434_v23 = vmul.u32.u64.low %v418_v37, %v93_v15  ;;  %v435_v24 = vmul.u32.u64.high %v418_v37, %v93_v15, %v434_v23 }
  0xaf   :  { %v182_v27 = vor.u32 %v181_v17, %v180_v13  ;;  %v184_v29 = vshrl.u32 %v375_v48, %v175_v62  ;;  %v186_v30 = vshll.u32 %v375_v48, %v174_v43  ;;  %v187_v31 = vshrl.u32 %v376_v50, %v175_v62 }
  0xb0   :  { %v190_v32 = vshrl.u32 %v377_v57, %v175_v62  ;;  %v105_v34 = vmul.u32 %v418_v37, %v89_v14  ;;  %v176_v35 = vshrl.u32 %v372_v40, %v175_v62  ;;  %v189_v39 = vshll.u32 %v376_v50, %v174_v43 }
  0xb1   :  { %v185_v36 = vor.u32 %v184_v29, %v183_v28  ;;  %vm107_vm7 = vc.u32 %v431_v22, %v434_v23  ;;  %v108_v41 = vadd.s32 1, %v435_v24  ;;  %v188_v44 = vor.u32 %v187_v31, %v186_v30 }
  0xb2   :  { %vm192_vm8 = vcmp.lt.s32.totalorder %v421_v42, 1  ;;  %v191_v45 = vor.u32 %v190_v32, %v189_v39  ;;  %vm194_vm9 = vcmp.lt.s32.totalorder %v421_v42, 3  ;;  %vm195_vm10 = vcmp.lt.s32.totalorder %v421_v42, 4 }
  0xb3   :  { %v200_v46 = vsel %vm192_vm8, %v179_v26, %v182_v27  ;;  %v109_v38 = vsel %vm107_vm7, %v108_v41, %v435_v24  ;;  %v197_v47 = vsel %vm195_vm10, %v185_v36, 2102212464  ;;  %v201_v37 = vsel %vm195_vm10, %v188_v44, 920167782 }
  0xb4   :  { %v204_v40 = vsel %vm192_vm8, %v182_v27, %v185_v36  ;;  %v110_v48 = vadd.s32 %v109_v38, %v105_v34  ;;  %vm193_vm11 = vcmp.lt.s32.totalorder %v421_v42, 2  ;;  %v202_v43 = vsel %vm194_vm9, %v185_v36, %v201_v37 }
  0xb5   :  { %v205_v49 = vsel %vm195_vm10, %v191_v45, 1326507024  ;;  %v196_v50 = vsel %vm192_vm8, %v176_v35, %v179_v26  ;;  %v198_v51 = vsel %vm194_vm9, %v182_v27, %v197_v47  ;;  %v203_v52 = vsel %vm193_vm11, %v200_v46, %v202_v43 }
  0xb6   :  { %v206_v53 = vsel %vm194_vm9, %v188_v44, %v205_v49  ;;  %v111_v54 = vadd.s32 536870912, %v110_v48  ;;  %v445_v56 = vmul.u32.u64.low %v208_v33, %v203_v52  ;;  %v446_v57 = vmul.u32.u64.high %v208_v33, %v203_v52, %v445_v56 }
  0xb7   :  { %v207_v55 = vsel %vm193_vm11, %v204_v40, %v206_v53  ;;  %v199_v61 = vsel %vm193_vm11, %v196_v50, %v198_v51  ;;  %v106_v14 = vadd.s32 %v434_v23, %v431_v22  ;;  %vm142_vm6 = vweird.f32 %v404_v18 }
  0xb8   :  { %v448_v58 = vmul.u32.u64.low %v208_v33, %v207_v55  ;;  %v449_v59 = vmul.u32.u64.high %v208_v33, %v207_v55, %v448_v58  ;;  %v112_v60 = vshrl.u32 %v111_v54, 30  ;;  %v218_v63 = vadd.s32 1, %v446_v57 }
  0xb9   :  { %v215_v42 = vmul.u32 %v208_v33, %v199_v61  ;;  %vm252_vm10 = vweird.f32 %v406_v19  ;;  %vm265_vm11 = vcmask 261120  }
  0xba   :  { %v113_v62 = vshll.u32 %v112_v60, 30  ;;  %vm217_vm12 = vc.u32 %v449_v59, %v445_v56  ;;  %v216_v35 = vadd.s32 %v445_v56, %v449_v59  ;;  %v136_v23 = vsub.s32 4, %v112_v60 }
  0xbb   :  { %v219_v2 = vsel %vm217_vm12, %v218_v63, %v446_v57 }
  0xbc   :  { %v114_v0 = vsub.s32 %v110_v48, %v113_v62  ;;  %v220_v3 = vadd.s32 %v219_v2, %v215_v42  ;;  %v137_v40 = vsel %vm52_vm15, %v136_v23, %v112_v60 }
  0xbd   :  { %v139_v51 = vsel %vm51_vm0, 0, %v137_v40 }
  0xbe   :  { %v116_v4 = vsub.s32 0, %v114_v0  ;;  %v221_v5 = vadd.s32 536870912, %v220_v3  ;;  %v143_v54 = vadd.s32 3, %v139_v51 }
  0xc0   :  { %v283_v6 = vmin.u32 %v116_v4, %v114_v0  ;;  %v222_v7 = vshrl.u32 %v221_v5, 30  ;;  %v144_v58 = vand.u32 3, %v143_v54 }
  0xc2   :  { %v118_v8 = vclz %v283_v6  ;;  %v223_v9 = vshll.u32 %v222_v7, 30  ;;  %v246_v53 = vsub.s32 4, %v222_v7  ;;  %vm149_vm3 = vcmp.eq.s32.totalorder %v144_v58, 2 }
  0xc3   :  { %vm146_vm4 = vcmp.eq.s32.totalorder %v144_v58, 0  ;;  %vm145_vm5 = vcmp.lt.s32.totalorder %v144_v58, 2 }
  0xc4   :  { %v284_v10 = vadd.s32 4294967294, %v118_v8  ;;  %v224_v11 = vsub.s32 %v220_v3, %v223_v9  ;;  %v247_v56 = vsel %vm162_vm1, %v246_v53, %v222_v7 }
  0xc5   :  { %v249_v60 = vsel %vm161_vm2, 0, %v247_v56 }
  0xc6   :  { %vm285_vm13 = vcmp.lt.s32.totalorder %v284_v10, 0  ;;  %v226_v13 = vsub.s32 0, %v224_v11 }
  0xc7   :  { %v121_v12 = vsel %vm285_vm13, 0, %v284_v10 }
  0xc8   :  { %v122_v15 = vsub.s32 32, %v121_v12  ;;  %v126_v16 = vsub.s32 4294967266, %v121_v12  ;;  %v287_v17 = vmin.u32 %v226_v13, %v224_v11  ;;  %v123_v21 = vshll.u32 %v114_v0, %v121_v12 }
  0xc9   :  { %v253_v0 = vadd.s32 3, %v249_v60 }
  0xca   :  { %v124_v24 = vshrl.u32 %v106_v14, %v122_v15  ;;  %v127_v26 = vadd.s32 127, %v126_v16  ;;  %v228_v27 = vclz %v287_v17 }
  0xcb   :  { %v254_v25 = vand.u32 3, %v253_v0 }
  0xcc   :  { %v125_v28 = vor.u32 %v124_v24, %v123_v21  ;;  %v128_v29 = vshll.u32 %v127_v26, 23  ;;  %v288_v30 = vadd.s32 4294967294, %v228_v27 }
  0xcd   :  { %vm259_vm7 = vcmp.eq.s32.totalorder %v254_v25, 2  ;;  %vm256_vm8 = vcmp.eq.s32.totalorder %v254_v25, 0  ;;  %vm255_vm9 = vcmp.lt.s32.totalorder %v254_v25, 2 }
  0xce   :  { %v129_v31 = vor.u32 4788187, %v128_v29  ;;  %vm289_vm14 = vcmp.lt.s32.totalorder %v288_v30, 0  ;;  %v132_v33 = vcvt.s32.f32 %v125_v28 }
  0xcf   :  { %v231_v34 = vsel %vm289_vm14, 0, %v288_v30 }
  0xd0   :  { %v130_v32 = vand.u32 2147483647, %v129_v31  ;;  %v232_v36 = vsub.s32 32, %v231_v34  ;;  %v236_v39 = vsub.s32 4294967266, %v231_v34  ;;  %v233_v41 = vshll.u32 %v224_v11, %v231_v34 }
  0xd2   :  { %v133_v22 = vmul.f32 %v132_v33, %v130_v32  ;;  %v234_v44 = vshrl.u32 %v216_v35, %v232_v36  ;;  %v237_v45 = vadd.s32 127, %v236_v39 }
  0xd4   :  { %v134_v46 = vxor.u32 2147483648, %v133_v22  ;;  %v235_v38 = vor.u32 %v234_v44, %v233_v41  ;;  %v238_v47 = vshll.u32 %v237_v45, 23 }
  0xd6   :  { %v135_v37 = vsel %vm52_vm15, %v134_v46, %v133_v22  ;;  %v239_v43 = vor.u32 4788187, %v238_v47  ;;  %v242_v50 = vcvt.s32.f32 %v235_v38 }
  0xd7   :  { %v138_v48 = vsel %vm51_vm0, %v404_v18, %v135_v37 }
  0xd8   :  { %313 = vcosq.f32 %v138_v48  ;;  %v240_v49 = vand.u32 2147483647, %v239_v43 }
  0xd9   :  { %315 = vsinq.f32 %v138_v48 }
  0xda   :  { %v243_v52 = vmul.f32 %v242_v50, %v240_v49 }
  0xdc   :  { %v244_v55 = vxor.u32 2147483648, %v243_v52 }
  0xde   :  { %v245_v20 = vsel %vm162_vm1, %v244_v55, %v243_v52 }
  0xdf   :  { %v248_v57 = vsel %vm161_vm2, %v406_v19, %v245_v20 }
  0xe0   :  { %317 = vcosq.f32 %v248_v57 }
  0xe1   :  { %319 = vsinq.f32 %v248_v57 }
  0xe2   :  { %v314_v59 = vpop.eup %313 }
  0xe3   :  { %v316_v61 = vpop.eup %315  ;;  %v150_v62 = vxor.u32 2147483648, %v314_v59 }
  0xe4   :  { %v147_v63 = vxor.u32 2147483648, %v316_v61 }
  0xe5   :  { %v151_v42 = vsel %vm149_vm3, %v150_v62, %v316_v61 }
  0xe6   :  { %v148_v2 = vsel %vm146_vm4, %v314_v59, %v147_v63 }
  0xe7   :  { %v152_v3 = vsel %vm145_vm5, %v148_v2, %v151_v42 }
  0xe8   :  { %v153_v5 = vsel %vm142_vm6, nan, %v152_v3 }
  0xe9   :  { %v154_v9 = vadd.f32 %v153_v5, %v401_v1 }
  0xea   :  { %v318_v4 = vpop.eup %317 }
  0xeb   :  { %v320_v6 = vpop.eup %319  ;;  %v260_v7 = vxor.u32 2147483648, %v318_v4 }
  0xec   :  { %v257_v8 = vxor.u32 2147483648, %v320_v6 }
  0xed   :  { %v261_v10 = vsel %vm259_vm7, %v260_v7, %v320_v6 }
  0xee   :  { %v258_v11 = vsel %vm256_vm8, %v318_v4, %v257_v8 }
  0xef   :  { %v262_v12 = vsel %vm255_vm9, %v258_v11, %v261_v10 }
  0xf0   :  { %v263_v13 = vsel %vm252_vm10, nan, %v262_v12 }
  0xf1   :  { %v264_v18 = vadd.f32 %v263_v13, %v154_v9 }
  0xf3   :  { %266 = vst.msk [vmem:[#allocation5] sm:$0xff] %vm265_vm11, %v264_v18 }
  0xf4   :  { %354 = shalt.err (!%p351_p12)
}
  0xf5   :  { %s355_s22 = scalar_lea.hbm %s480_s1, 128 }
  0xf6   :  { %p356_p13 = scmp.ne.s32.totalorder %s480_s1, %s355_s22  ;;  %p359_p0 = scmp.lt.u32.totalorder %s355_s22, %s480_s1 }
  0xf8   :  { %p361_p1 = pnand %p359_p0, %p356_p13 }
  0xfa   :  { %364 = shalt.err (!%p361_p1)
}
  0xfb   :  { %276 = dma.vmem_to_hbm [thread:$0]  %s274_s18, 128, %s480_s1, [#allocation4]  }
  0xfc   :  { %367 = dma.done.wait [#allocation4], 128  }
  0xfd   :  { %368 = vsyncadd [#allocation4], 4294967168 }
  0xfe   :  { %280 = vsyncpa [#allocation3], 1 }
  0xff   :  { %281 = vsyncpa [#allocation4], 1 }

</bundles_post_ra>
